<compile_context>
chip_gen: v6e
topology: v6e:2x2x1
jax: 0.10.0
libtpu: 0.0.40
codegen_flags: <defaults>
</compile_context>

<pallas_src>
import functools
import math

import jax
import jax.numpy as jnp
from jax.experimental import pallas as pl
from jax.experimental.pallas import tpu as pltpu


def _round_up(x, m):
    return ((x + m - 1) // m) * m


def _pow_static(base, gamma):
    """base ** gamma specialized for common exponents (avoids EUP exp+log)."""
    g = float(gamma)
    if g == 0.0:
        return jnp.ones_like(base)
    if g == 1.0:
        return base
    if g == 2.0:
        return base * base
    if g == 3.0:
        return base * base * base
    if g == 4.0:
        b2 = base * base
        return b2 * b2
    return base ** g


# ---------------------------------------------------------------------------
# Multi-class branch:  cross-entropy (weight=None) + asymmetric focal weight
# ---------------------------------------------------------------------------
def _afl_multiclass_kernel(logits_ref, tgt_ref, out_ref, acc_ref,
                           *, alpha, gamma_pos, t_hw, hw, needs_mask):
    j = pl.program_id(1)

    @pl.when(j == 0)
    def _():
        acc_ref[...] = jnp.zeros_like(acc_ref)

    x = logits_ref[...].astype(jnp.float32)          # [C, t_hw], classes on sublanes
    t = tgt_ref[...]                                 # [1, t_hw] int32

    if needs_mask:
        col = jax.lax.broadcasted_iota(jnp.int32, (1, t_hw), 1)
        valid = (j * t_hw + col) < hw                # [1, t_hw]
        x = jnp.where(valid, x, 0.0)                 # keep tail garbage finite

    # numerically stable log-softmax over the (small) class/sublane axis
    m = jnp.max(x, axis=0, keepdims=True)                               # [1, t_hw]
    lse = m + jnp.log(jnp.sum(jnp.exp(x - m), axis=0, keepdims=True))   # [1, t_hw]
    row = jax.lax.broadcasted_iota(jnp.int32, x.shape, 0)               # class ids
    onehot = (row == t).astype(jnp.float32)                             # [C, t_hw]
    x_t = jnp.sum(x * onehot, axis=0, keepdims=True)                    # [1, t_hw]
    ce = lse - x_t                                                      # [1, t_hw]

    p_t = jnp.exp(-ce)
    focal = (alpha * _pow_static(1.0 - p_t, gamma_pos)) * ce            # [1, t_hw]
    if needs_mask:
        focal = jnp.where(valid, focal, 0.0)

    acc_ref[...] += focal                            # per-lane partial sums

    @pl.when(j == pl.num_programs(1) - 1)
    def _():
        partial = jnp.sum(acc_ref[...])              # one cross-lane reduce per n
        out_ref[...] = jnp.broadcast_to(partial, out_ref.shape).astype(out_ref.dtype)


def asymmetric_focal_loss_multiclass(logits, targets, *,
                                     alpha=0.25, gamma_pos=1.0,
                                     reduction="mean", t_hw_max=8192):
    """logits: [N, C, *spatial] float; targets: [N, *spatial] integer classes."""
    N, C = int(logits.shape[0]), int(logits.shape[1])
    HW = int(math.prod(logits.shape[2:])) if logits.ndim > 2 else 1
    M = N * HW

    # Zero-copy reshapes (no NCHW -> NHWC transpose; spatial axis goes on lanes).
    logits3 = logits.reshape(N, C, HW)
    targets3 = targets.reshape(N, 1, HW).astype(jnp.int32)

    t_hw = min(int(t_hw_max), _round_up(HW, 128))
    grid_hw = pl.cdiv(HW, t_hw)
    needs_mask = (HW % t_hw) != 0

    kernel = functools.partial(
        _afl_multiclass_kernel, alpha=float(alpha), gamma_pos=float(gamma_pos),
        t_hw=t_hw, hw=HW, needs_mask=needs_mask)

    partials = pl.pallas_call(
        kernel,
        out_shape=jax.ShapeDtypeStruct((N, 1, 128), jnp.float32),
        grid_spec=pltpu.PrefetchScalarGridSpec(
            num_scalar_prefetch=0,
            grid=(N, grid_hw),
            in_specs=[
                pl.BlockSpec((pl.Squeezed(), C, t_hw), lambda n, j: (n, 0, j)),
                pl.BlockSpec((pl.Squeezed(), 1, t_hw), lambda n, j: (n, 0, j)),
            ],
            out_specs=pl.BlockSpec((pl.Squeezed(), 1, 128),
                                   lambda n, j: (n, 0, 0)),
            scratch_shapes=[pltpu.VMEM((1, t_hw), jnp.float32)],
        ),
        compiler_params=pltpu.CompilerParams(
            dimension_semantics=("parallel", "arbitrary")),
    )(logits3, targets3)

    total = jnp.sum(partials[:, 0, 0])               # tiny (N-element) finish in JAX
    if reduction == "mean":
        return total / float(M)
    elif reduction == "sum":
        return total
    else:
        # TODO(synk): reduction='none' (per-pixel loss map output) not implemented.
        raise NotImplementedError("reduction='none' not supported")


# ---------------------------------------------------------------------------
# Binary branch:  BCE-with-logits + asymmetric focal weight (tiled, lane-dense)
# ---------------------------------------------------------------------------
def _afl_binary_kernel(x_ref, y_ref, out_ref, acc_ref,
                       *, alpha, gamma_pos, gamma_neg, t, m, needs_mask):
    i = pl.program_id(0)

    @pl.when(i == 0)
    def _():
        acc_ref[...] = jnp.zeros_like(acc_ref)

    x = x_ref[...].astype(jnp.float32)               # [1, t]
    y = y_ref[...].astype(jnp.float32)               # [1, t]

    if needs_mask:
        col = jax.lax.broadcasted_iota(jnp.int32, (1, t), 1)
        valid = (i * t + col) < m
        x = jnp.where(valid, x, 0.0)
        y = jnp.where(valid, y, 0.0)

    # stable binary_cross_entropy_with_logits
    ce = jnp.maximum(x, 0.0) - x * y + jnp.log1p(jnp.exp(-jnp.abs(x)))
    p = jax.nn.sigmoid(x)
    p_t = p * y + (1.0 - p) * (1.0 - y)
    alpha_t = alpha * y + (1.0 - alpha) * (1.0 - y)
    fw = (alpha_t * _pow_static(1.0 - p_t, gamma_pos) * y
          + (1.0 - alpha_t) * _pow_static(p_t, gamma_neg) * (1.0 - y))
    focal = fw * ce
    if needs_mask:
        focal = jnp.where(valid, focal, 0.0)

    acc_ref[...] += focal

    @pl.when(i == pl.num_programs(0) - 1)
    def _():
        partial = jnp.sum(acc_ref[...])
        out_ref[...] = jnp.broadcast_to(partial, out_ref.shape).astype(out_ref.dtype)


def asymmetric_focal_loss_binary(logits, targets, *,
                                 alpha=0.25, gamma_pos=1.0, gamma_neg=4.0,
                                 reduction="mean", t_max=8192):
    M = int(logits.size)
    x = logits.reshape(1, M)                         # zero-copy; no f32 pre-cast
    y = targets.reshape(1, M)

    t = min(int(t_max), _round_up(M, 128))
    grid_m = pl.cdiv(M, t)
    needs_mask = (M % t) != 0

    kernel = functools.partial(
        _afl_binary_kernel, alpha=float(alpha), gamma_pos=float(gamma_pos),
        gamma_neg=float(gamma_neg), t=t, m=M, needs_mask=needs_mask)

    out = pl.pallas_call(
        kernel,
        out_shape=jax.ShapeDtypeStruct((1, 128), jnp.float32),
        grid_spec=pltpu.PrefetchScalarGridSpec(
            num_scalar_prefetch=0,
            grid=(grid_m,),
            in_specs=[
                pl.BlockSpec((1, t), lambda i: (0, i)),
                pl.BlockSpec((1, t), lambda i: (0, i)),
            ],
            out_specs=pl.BlockSpec((1, 128), lambda i: (0, 0)),
            scratch_shapes=[pltpu.VMEM((1, t), jnp.float32)],
        ),
        compiler_params=pltpu.CompilerParams(
            dimension_semantics=("arbitrary",)),
    )(x, y)

    total = out[0, 0]
    if reduction == "mean":
        return total / float(M)
    elif reduction == "sum":
        return total
    else:
        # TODO(synk): reduction='none' not implemented.
        raise NotImplementedError("reduction='none' not supported")


# ---------------------------------------------------------------------------
# Pure-JAX references (mirror the PyTorch forward) for verification
# ---------------------------------------------------------------------------
def _ref_multiclass(logits_nchw, targets, alpha=0.25, gamma_pos=1.0):
    logp = jax.nn.log_softmax(logits_nchw.astype(jnp.float32), axis=1)
    ce = -jnp.take_along_axis(logp, targets[:, None].astype(jnp.int32),
                              axis=1)[:, 0]
    p_t = jnp.exp(-ce)
    return jnp.mean(alpha * (1.0 - p_t) ** gamma_pos * ce)


def _ref_binary(x, y, alpha=0.25, gamma_pos=1.0, gamma_neg=4.0):
    x = x.astype(jnp.float32)
    y = y.astype(jnp.float32)
    ce = jnp.maximum(x, 0.0) - x * y + jnp.log1p(jnp.exp(-jnp.abs(x)))
    p = jax.nn.sigmoid(x)
    p_t = p * y + (1.0 - p) * (1.0 - y)
    a_t = alpha * y + (1.0 - alpha) * (1.0 - y)
    fw = (a_t * (1.0 - p_t) ** gamma_pos * y
          + (1.0 - a_t) * p_t ** gamma_neg * (1.0 - y))
    return jnp.mean(fw * ce)


if __name__ == "__main__":
    key = jax.random.PRNGKey(0)
    k1, k2, k3, k4, k5, k6 = jax.random.split(key, 6)

    # multi-class example: NCHW logits + integer targets
    N, C, H, W = 2, 4, 16, 16
    logits = jax.random.normal(k1, (N, C, H, W), dtype=jnp.float32)
    targets = jax.random.randint(k2, (N, H, W), 0, C, dtype=jnp.int32)

    loss = jax.block_until_ready(asymmetric_focal_loss_multiclass(logits, targets))
    ref = _ref_multiclass(logits, targets)
    assert jnp.allclose(loss, ref, rtol=1e-5, atol=1e-6), (loss, ref)

    # multi-class with a non-128-divisible spatial size (exercises tail masking
    # and a multi-tile inner grid)
    H2, W2 = 16, 18   # HW = 288, tiles of 128 -> 3 tiles, masked tail
    logits2 = jax.random.normal(k5, (1, C, H2, W2), dtype=jnp.float32)
    targets2 = jax.random.randint(k6, (1, H2, W2), 0, C, dtype=jnp.int32)
    loss2 = jax.block_until_ready(
        asymmetric_focal_loss_multiclass(logits2, targets2, t_hw_max=128))
    ref2 = _ref_multiclass(logits2, targets2)
    assert jnp.allclose(loss2, ref2, rtol=1e-5, atol=1e-6), (loss2, ref2)

    # binary example: single-logit path
    xb = jax.random.normal(k3, (128, 1), dtype=jnp.float32)
    yb = (jax.random.uniform(k4, (128, 1)) > 0.5).astype(jnp.float32)
    loss_b = jax.block_until_ready(asymmetric_focal_loss_binary(xb, yb))
    ref_b = _ref_binary(xb, yb)
    assert jnp.allclose(loss_b, ref_b, rtol=1e-5, atol=1e-6), (loss_b, ref_b)

    print("KERNEL_OK")
</pallas_src>

<mosaic_0001>
module attributes {stable_mosaic.version = 11 : i64} {
  func.func @_afl_multiclass_kernel(%arg0: i32, %arg1: i32, %arg2: memref<1x4x256xf32, #tpu.memory_space<vmem>>, %arg3: memref<1x1x256xi32, #tpu.memory_space<vmem>>, %arg4: memref<1x1x128xf32, #tpu.memory_space<vmem>>, %arg5: memref<1x256xf32, #tpu.memory_space<vmem>>) attributes {dimension_semantics = [#tpu.dimension_semantics<parallel>, #tpu.dimension_semantics<arbitrary>], iteration_bounds = array<i64: 2, 1>, scalar_prefetch = 0 : i64, scratch_operands = 1 : i64, tpu.core_type = #tpu.core_type<tc>, window_params = [{transform_indices = @transform_0, window_bounds = array<i64: 1, 4, 256>}, {transform_indices = @transform_1, window_bounds = array<i64: 1, 1, 256>}, {transform_indices = @transform_2, window_bounds = array<i64: 1, 1, 128>}]} {
    %c0_i32 = arith.constant 0 : i32
    %0 = arith.cmpi eq, %arg1, %c0_i32 : i32
    %1 = arith.extui %0 : i1 to i32
    %c0_i32_0 = arith.constant 0 : i32
    %2 = arith.cmpi ne, %1, %c0_i32_0 : i32
    scf.if %2 {
      %cst_17 = arith.constant 0.000000e+00 : f32
      %39 = vector.broadcast %cst_17 : f32 to vector<1x256xf32>
      %c0_18 = arith.constant 0 : index
      %c0_19 = arith.constant 0 : index
      %40 = vector.load %arg5[%c0_18, %c0_19] : memref<1x256xf32, #tpu.memory_space<vmem>>, vector<1x256xf32>
      tpu.vector_store %arg5[%c0_18, %c0_19], %39 {strides = array<i32>} : memref<1x256xf32, #tpu.memory_space<vmem>>, vector<1x256xf32>,
    } else {
    }
    %c0 = arith.constant 0 : index
    %c0_1 = arith.constant 0 : index
    %c0_2 = arith.constant 0 : index
    %3 = vector.load %arg2[%c0, %c0_1, %c0_2] : memref<1x4x256xf32, #tpu.memory_space<vmem>>, vector<1x4x256xf32>
    %4 = vector.shape_cast %3 : vector<1x4x256xf32> to vector<4x256xf32>
    %c0_3 = arith.constant 0 : index
    %c0_4 = arith.constant 0 : index
    %c0_5 = arith.constant 0 : index
    %5 = vector.load %arg3[%c0_3, %c0_4, %c0_5] : memref<1x1x256xi32, #tpu.memory_space<vmem>>, vector<1x1x256xi32>
    %6 = vector.shape_cast %5 : vector<1x1x256xi32> to vector<1x256xi32>
    %cst = arith.constant dense<0xFF800000> : vector<256xf32>
    %7 = vector.multi_reduction <maximumf>, %4, %cst [0] : vector<4x256xf32> to vector<256xf32>
    %8 = vector.shape_cast %7 : vector<256xf32> to vector<1x256xf32>
    %9 = vector.broadcast %8 : vector<1x256xf32> to vector<4x256xf32>
    %10 = arith.subf %4, %9 : vector<4x256xf32>
    %11 = math.exp %10 : vector<4x256xf32>
    %cst_6 = arith.constant dense<0.000000e+00> : vector<256xf32>
    %12 = vector.multi_reduction <add>, %11, %cst_6 [0] : vector<4x256xf32> to vector<256xf32>
    %13 = vector.shape_cast %12 : vector<256xf32> to vector<1x256xf32>
    %14 = math.log %13 : vector<1x256xf32>
    %15 = arith.addf %8, %14 : vector<1x256xf32>
    %16 = tpu.iota {dimensions = array<i32: 0>} : vector<4x256xi32>
    %17 = vector.broadcast %6 : vector<1x256xi32> to vector<4x256xi32>
    %18 = arith.cmpi eq, %16, %17 : vector<4x256xi32>
    %19 = arith.extui %18 : vector<4x256xi1> to vector<4x256xi32>
    %20 = arith.sitofp %19 : vector<4x256xi32> to vector<4x256xf32>
    %21 = arith.mulf %4, %20 : vector<4x256xf32>
    %cst_7 = arith.constant dense<0.000000e+00> : vector<256xf32>
    %22 = vector.multi_reduction <add>, %21, %cst_7 [0] : vector<4x256xf32> to vector<256xf32>
    %23 = vector.shape_cast %22 : vector<256xf32> to vector<1x256xf32>
    %24 = arith.subf %15, %23 : vector<1x256xf32>
    %cst_8 = arith.constant 0.000000e+00 : f32
    %25 = vector.broadcast %cst_8 : f32 to vector<1x256xf32>
    %26 = arith.subf %25, %24 : vector<1x256xf32>
    %27 = math.exp %26 : vector<1x256xf32>
    %cst_9 = arith.constant 1.000000e+00 : f32
    %28 = vector.broadcast %cst_9 : f32 to vector<1x256xf32>
    %29 = arith.subf %28, %27 : vector<1x256xf32>
    %cst_10 = arith.constant 2.500000e-01 : f32
    %30 = vector.broadcast %cst_10 : f32 to vector<1x256xf32>
    %31 = arith.mulf %30, %29 : vector<1x256xf32>
    %32 = arith.mulf %31, %24 : vector<1x256xf32>
    %c0_11 = arith.constant 0 : index
    %c0_12 = arith.constant 0 : index
    %33 = vector.load %arg5[%c0_11, %c0_12] : memref<1x256xf32, #tpu.memory_space<vmem>>, vector<1x256xf32>
    %34 = arith.addf %33, %32 : vector<1x256xf32>
    %c0_13 = arith.constant 0 : index
    %c0_14 = arith.constant 0 : index
    %35 = vector.load %arg5[%c0_13, %c0_14] : memref<1x256xf32, #tpu.memory_space<vmem>>, vector<1x256xf32>
    tpu.vector_store %arg5[%c0_13, %c0_14], %34 {strides = array<i32>} : memref<1x256xf32, #tpu.memory_space<vmem>>, vector<1x256xf32>,
    %c0_i32_15 = arith.constant 0 : i32
    %36 = arith.cmpi eq, %arg1, %c0_i32_15 : i32
    %37 = arith.extui %36 : i1 to i32
    %c0_i32_16 = arith.constant 0 : i32
    %38 = arith.cmpi ne, %37, %c0_i32_16 : i32
    scf.if %38 {
      %c0_17 = arith.constant 0 : index
      %c0_18 = arith.constant 0 : index
      %39 = vector.load %arg5[%c0_17, %c0_18] : memref<1x256xf32, #tpu.memory_space<vmem>>, vector<1x256xf32>
      %40 = vector.shape_cast %39 : vector<1x256xf32> to vector<1x1x256xf32>
      %cst_19 = arith.constant dense<0.000000e+00> : vector<1xf32>
      %41 = vector.multi_reduction <add>, %40, %cst_19 [1, 2] : vector<1x1x256xf32> to vector<1xf32>
      %42 = vector.shape_cast %41 : vector<1xf32> to vector<1x1x1xf32>
      %43 = vector.extract %42[0, 0, 0] : f32 from vector<1x1x1xf32>
      %44 = vector.broadcast %43 : f32 to vector<1x128xf32>
      %c0_20 = arith.constant 0 : index
      %c0_21 = arith.constant 0 : index
      %c0_22 = arith.constant 0 : index
      %45 = vector.load %arg4[%c0_20, %c0_21, %c0_22] : memref<1x1x128xf32, #tpu.memory_space<vmem>>, vector<1x1x128xf32>
      %46 = vector.shape_cast %45 : vector<1x1x128xf32> to vector<1x128xf32>
      %47 = vector.shape_cast %44 : vector<1x128xf32> to vector<1x1x128xf32>
      tpu.vector_store %arg4[%c0_20, %c0_21, %c0_22], %47 {strides = array<i32>} : memref<1x1x128xf32, #tpu.memory_space<vmem>>, vector<1x1x128xf32>,
    } else {
    }
    return
  }
  func.func @transform_0(%arg0: i32, %arg1: i32) -> (i32, i32, i32) {
    %c0_i32 = arith.constant 0 : i32
    %c0_i32_0 = arith.constant 0 : i32
    return %arg0, %c0_i32, %arg1 : i32, i32, i32
  }
  func.func @transform_1(%arg0: i32, %arg1: i32) -> (i32, i32, i32) {
    %c0_i32 = arith.constant 0 : i32
    %c0_i32_0 = arith.constant 0 : i32
    return %arg0, %c0_i32, %arg1 : i32, i32, i32
  }
  func.func @transform_2(%arg0: i32, %arg1: i32) -> (i32, i32, i32) {
    %c0_i32 = arith.constant 0 : i32
    %c0_i32_0 = arith.constant 0 : i32
    %c0_i32_1 = arith.constant 0 : i32
    return %arg0, %c0_i32, %c0_i32_0 : i32, i32, i32
  }
}

</mosaic_0001>

<bundles_post_ra>
// kernel: tpu_custom_call.1
= control target key start
LH: loop header
LB: loop body
LE: loop exit
PB: predicated region body
PF: predicated region fallthrough
CT: control target
= control target key end

     0   :  { %7 = vsyncpa [#allocation4], 0  ;;  %s965_s0 = inlined_call_operand.hbm [shape: f32[2,4,256], index: 0, kind: input, shape index: {}]   ;;  %s966_s1 = inlined_call_operand.hbm [shape: s32[2,1,256], index: 1, kind: input, shape index: {}]   ;;  %s967_s2 = inlined_call_operand.hbm [shape: f32[2,1,128], index: 2, kind: output, shape index: {}]  }
   0x1   :  { %9 = vsyncpa [#allocation4 + $0x1], 0 }
   0x2   :  { %10 = vsyncpa [#allocation7], 0 }
   0x3   :  { %12 = vsyncpa [#allocation7 + $0x1], 0 }
   0x4   :  { %13 = vsyncpa [#allocation5], 0 }
   0x5   :  { %15 = vsyncpa [#allocation5 + $0x1], 0  ;;  %s765_s9 = smov 0   ;;  %s767_s10 = smov 0  }
   0x6   :  { %s769_s11 = smov 0   ;;  %s771_s12 = smov 0  }
   0x7   :  { %s773_s13 = smov 0   ;;  %s775_s14 = smov 0  }
   0x8 LB: > { %s501_s15 = sadd.s32 4294967295, %s743_s14   ;;  %s502_s16 = sadd.s32 4294967294, %s743_s14   ;;  %s743_s14 = sphi %s775_s14, %s21_s14   ;;  %s739_s13 = sphi %s773_s13, %s981_s13   ;;  %s735_s12 = sphi %s771_s12, %s980_s12   ;;  %s731_s11 = sphi %s769_s11, %s979_s11   ;;  %s727_s10 = sphi %s767_s10, %s978_s10   ;;  %s723_s9 = sphi %s765_s9, %s977_s9  }
   0x9   : > { %s33_s17 = sadd.s32 1, %s739_s13  ;;  %s42_s18 = sadd.s32 1, %s731_s11 }
   0xa   : > { %p35_p0 = scmp.ge.s32.totalorder %s33_s17, 2  ;;  %p49_p1 = scmp.ne.s32.totalorder %s731_s11, %s727_s10 }
   0xb   : > { %p50_p2 = scmp.eq.s32.totalorder %s743_s14, 0  ;;  %p55_p3 = scmp.ne.s32.totalorder %s727_s10, %s723_s9 }
   0xc   : > { %s983_s17 = smov (%p35_p0, %s33_s17), 0  ;;  %p56_p5 = scmp.eq.s32.totalorder %s501_s15, 0 }
   0xd   : > { %p806_p4 = por %p50_p2, %p49_p1  ;;  %s37_s20 = ssub.s32 %s739_s13, %s983_s17 }
   0xe   : > { %p107_p6 = scmp.eq.s32.totalorder %s501_s15, 1  ;;  %p40_p7 = scmp.eq.s32.totalorder %s37_s20, 0 }
   0xf   : > { %p812_p8 = por %p56_p5, %p55_p3  ;;  %p113_p10 = scmp.eq.s32.totalorder %s502_s16, 1 }
  0x10   : > { %p816_p9 = por %p107_p6, %p49_p1  ;;  %p540_p13 = scmp.lt.s32.totalorder %s743_s14, 2 }
  0x11   : > { %s821_s23 = scalar_select %p40_p7, %s731_s11, %s42_s18  }
  0x12   : > { %p823_p11 = por %p113_p10, %p55_p3  ;;  %s830_s25 = sand.u32 1, %s731_s11  }
  0x13   : > { %s505_s26 = sshll.u32 %s830_s25, 3  ;;  %s519_s27 = sshll.u32 %s739_s13, 7 }
  0x14   : > { %s145_s30 = scalar_lea.hbm %s965_s0, %s519_s27  ;;  %s137_s3 = scalar_lea.vmem [#allocation3], %s505_s26 }
  0x15   : > { %s147_s4 = sshll.u32 %s137_s3, 4  ;;  %p839_p0 = pnand %p540_p13, %p806_p4  ;;  %s148_s4 = int_to_ptr.vmem [resolvable:$true] %s147_s4 }
  0x16   : > { %p511_p1 = scmp.ge.s32.totalorder %s743_s14, 1  ;;  %p173_p2 = scmp.lt.s32.totalorder %s743_s14, 3 }
  0x17   : > { %s134_s6 = scalar_lea.sflag [#allocation4], %s830_s25  ;;  %p605_p3 = pneg %p839_p0 }
  0x18   : > { %s616_s7 = scalar_lea.vmem %s148_s4, 128  ;;  %s745_s8 = smov [#allocation3]  }
  0x19   : > { %p617_p5 = scmp.ne.s32.totalorder %s148_s4, %s616_s7  ;;  %s621_s15 = sshll.u32 %s745_s8, 4  ;;  %s622_s15 = int_to_ptr.vmem [resolvable:$false] %s621_s15 }
  0x1a   : > { %s623_s16 = scalar_lea.vmem %s622_s15, 256  ;;  %p624_p4 = scmp.lt.s32.totalorder %s148_s4, %s622_s15 }
  0x1b   : > { %p619_p6 = pnand %p617_p5, %p605_p3  ;;  %p625_p10 = scmp.lt.s32.totalorder %s623_s16, %s616_s7 }
  0x1d   : > { %p620_p7 = pneg %p619_p6  ;;  %p626_p13 = por %p625_p10, %p624_p4 }
  0x1f   : > { %p627_p12 = pnand %p626_p13, %p620_p7 }
  0x21   : > { %630 = shalt.err (!%p627_p12)
}
  0x22   : > { %532 = dma.hbm_to_vmem [thread:$0]  (!%p839_p0), %s145_s30, 128, %s148_s4, %s134_s6  }
  0x23   : > { %p857_p5 = pnand %p511_p1, %p173_p2  ;;  %s508_s19 = sshll.u32 %s830_s25, 1 }
  0x24   : > { %s520_s20 = sshll.u32 %s739_s13, 5  ;;  %s158_s29 = scalar_lea.vmem [#allocation6], %s508_s19 }
  0x25   : > { %s166_s28 = scalar_lea.hbm %s966_s1, %s520_s20  ;;  %s168_s3 = sshll.u32 %s158_s29, 4  ;;  %s169_s3 = int_to_ptr.vmem [resolvable:$true] %s168_s3 }
  0x26   : > { %s155_s7 = scalar_lea.sflag [#allocation7], %s830_s25  ;;  %s644_s8 = scalar_lea.vmem %s169_s3, 32 }
  0x27   : > { %p645_p12 = scmp.ne.s32.totalorder %s169_s3, %s644_s8  ;;  %s746_s30 = smov [#allocation6]  }
  0x28   : > { %s649_s4 = sshll.u32 %s746_s30, 4  ;;  %s650_s4 = int_to_ptr.vmem [resolvable:$false] %s649_s4 }
  0x29   : > { %p647_p6 = pnand %p645_p12, %p605_p3  ;;  %s651_s6 = scalar_lea.vmem %s650_s4, 64 }
  0x2a   : > { %p652_p1 = scmp.lt.s32.totalorder %s169_s3, %s650_s4  ;;  %p653_p2 = scmp.lt.s32.totalorder %s651_s6, %s644_s8 }
  0x2b   : > { %p648_p7 = pneg %p647_p6 }
  0x2c   : > { %p654_p4 = por %p653_p2, %p652_p1 }
  0x2e   : > { %p655_p10 = pnand %p654_p4, %p648_p7 }
  0x30   : > { %658 = shalt.err (!%p655_p10)
}
  0x31   : > { %535 = dma.hbm_to_vmem [thread:$0]  (!%p839_p0), %s166_s28, 32, %s169_s3, %s155_s7  }
  0x32   : > { %177 = sbr.rel (%p857_p5) target bundleno = 389 (0x185), region = 28  ;;  %s875_s25 = sand.u32 (!%p857_p5), 1, %s727_s10  }
  0x33   : > { %s512_s15 = sshll.u32 (!%p857_p5), %s875_s25, 3  ;;  %s180_s16 = scalar_lea.sflag (!%p857_p5), [#allocation4], %s875_s25 }
  0x34   : > { %s183_s19 = scalar_lea.vmem (!%p857_p5), [#allocation3], %s512_s15 }
  0x37   : > { %710 = dma.done.wait (%p812_p8), %s180_s16, 128  }
  0x38   : > { %712 = vsyncadd (%p812_p8), %s180_s16, 4294967168  ;;  %s513_s5 = sshll.u32 %s875_s25, 1  ;;  %s189_s18 = scalar_lea.sflag [#allocation7], %s875_s25 }
  0x39   : > { %s192_s20 = scalar_lea.vmem [#allocation6], %s513_s5 }
  0x3a   : > { %714 = dma.done.wait (%p812_p8), %s189_s18, 32  }
  0x3b   : > { %716 = vsyncadd (%p812_p8), %s189_s18, 4294967264  ;;  %v223_v0 = vlaneseq  ;;  %v747_v2 = vmov 0.0   ;;  %vm233_vm1 = vcmask 1043456   ;;  %v228_v3 = vld [vmem:[%s183_s19] sm:$0xff]  ;;  %v229_v23 = vld [vmem:[%s192_s20] sm:$0x3] }
  0x3c   : > { %v231_v4 = vcombine.high %v228_v3, %v228_v3  ;;  %v234_v5 = vsel %vm233_vm1, %v228_v3, -inf  ;;  %vm370_vm4 = vcmask 1040384   ;;  %s216_s21 = scalar_lea.vmem [#allocation8], %s875_s25  ;;  %s516_s27 = sshll.u32 %s735_s12, 4 }
  0x3d   : > { %vm889_vm0 = vcmp.lt.s32.totalorder %v223_v0, 256  ;;  %v235_v6 = vrot.slane %v234_v5, 4  ;;  %v897_v18 = vshrl.u32 %v223_v0, 7  ;;  %s398_s26 = sshll.u32 %s216_s21, 4  ;;  %s396_s7 = scalar_lea.hbm %s967_s2, %s516_s27  ;;  %s920_s26 = int_to_ptr.vmem [resolvable:$true] %s398_s26 }
  0x3e   : > { %227 = vst.msk [vmem:[#allocation2] sm:$0x3] %vm889_vm0, %v747_v2  ;;  %v241_v7 = vsel %vm233_vm1, %v231_v4, -inf  ;;  %s386_s8 = scalar_lea.sflag [#allocation5], %s875_s25  ;;  %s659_s30 = scalar_lea.vmem %s920_s26, 16 }
  0x3f   : > { %v236_v8 = vmax.f32 %v234_v5, %v235_v6  ;;  %v242_v9 = vrot.slane %v241_v7, 4  ;;  %v282_v21 = vsub.s32 0, %v897_v18  ;;  %v286_v22 = vsub.s32 1, %v897_v18  ;;  %p660_p8 = scmp.ne.s32.totalorder %s920_s26, %s659_s30  ;;  %s749_s4 = smov [#allocation8]  }
  0x40   : > { %s663_s12 = sshll.u32 %s749_s4, 4  ;;  %s664_s12 = int_to_ptr.vmem [resolvable:$false] %s663_s12 }
  0x41   : > { %v237_v10 = vrot.slane %v236_v8, 2  ;;  %v243_v11 = vmax.f32 %v241_v7, %v242_v9  ;;  %v283_v26 = vrot.slane %v229_v23, %v282_v21  ;;  %v287_v27 = vrot.slane %v229_v23, %v286_v22  ;;  %p661_p0 = pnand %p660_p8, %p816_p9  ;;  %s665_s6 = scalar_lea.vmem %s664_s12, 32 }
  0x42   : > { %p666_p13 = scmp.lt.s32.totalorder %s920_s26, %s664_s12  ;;  %p667_p5 = scmp.lt.s32.totalorder %s665_s6, %s659_s30 }
  0x43   : > { %v238_v12 = vmax.f32 %v236_v8, %v237_v10  ;;  %v244_v13 = vrot.slane %v243_v11, 2  ;;  %vm288_vm2 = vcmp.eq.s32.totalorder %v897_v18, %v283_v26  ;;  %vm289_vm3 = vcmp.eq.s32.totalorder %v897_v18, %v287_v27  ;;  %p662_p3 = pneg %p661_p0 }
  0x44   : > { %v514_v28 = vsel %vm288_vm2, 1.0, %v747_v2  ;;  %v515_v29 = vsel %vm289_vm3, 1.0, %v747_v2  ;;  %p668_p12 = por %p667_p5, %p666_p13 }
  0x45   : > { %v239_v14 = vrot.slane %v238_v12, 1  ;;  %v245_v15 = vmax.f32 %v243_v11, %v244_v13  ;;  %v296_v30 = vcombine.low %v514_v28, %v515_v29  ;;  %v330_v29 = vld [vmem:[#allocation2] sm:$0x3] }
  0x46   : > { %p669_p6 = pnand %p668_p12, %p662_p3 }
  0x47   : > { %v240_v16 = vmax.f32 %v238_v12, %v239_v14  ;;  %v246_v17 = vrot.slane %v245_v15, 1  ;;  %v298_v31 = vmul.f32 %v296_v30, %v228_v3  ;;  %v748_v12 = vmov 1966171168  }
  0x48   : > { %v335_v13 = vunpack.c.l.s4 %v748_v12 }
  0x49   : > { %v247_v19 = vmax.f32 %v245_v15, %v246_v17  ;;  %v300_v37 = vcombine.high %v298_v31, %v298_v31  ;;  %v302_v40 = vsel %vm233_vm1, %v298_v31, 0.0 }
  0x4a   : > { %v303_v46 = vrot.slane %v302_v40, 4 }
  0x4b   : > { %v250_v20 = vcombine.low %v240_v16, %v247_v19  ;;  %v309_v43 = vsel %vm233_vm1, %v300_v37, 0.0 }
  0x4c   : > { %v310_v49 = vrot.slane %v309_v43, 4  ;;  %v304_v52 = vadd.f32 %v303_v46, %v302_v40 }
  0x4d   : > { %v252_v24 = vsub.f32 %v228_v3, %v250_v20 }
  0x4e   : > { %v311_v54 = vadd.f32 %v310_v49, %v309_v43  ;;  %v305_v55 = vrot.slane %v304_v52, 2 }
  0x4f   : > { %v253_v25 = vmul.f32 1.442695, %v252_v24  ;;  %v336_v24 = vunpack.c.0.s8 %v335_v13 }
  0x50   : > { %v312_v56 = vrot.slane %v311_v54, 2  ;;  %v306_v57 = vadd.f32 %v305_v55, %v304_v52 }
  0x51   : > { %593 = vpow2.f32 %v253_v25 }
  0x52   : > { %v313_v58 = vadd.f32 %v312_v56, %v311_v54  ;;  %v307_v59 = vrot.slane %v306_v57, 1 }
  0x54   : > { %v314_v60 = vrot.slane %v313_v58, 1  ;;  %v308_v63 = vadd.f32 %v307_v59, %v306_v57 }
  0x56   : > { %v315_v4 = vadd.f32 %v314_v60, %v313_v58 }
  0x5e   : > { %v594_v32 = vpop.eup %593 }
  0x5f   : > { %v256_v33 = vcombine.high %v594_v32, %v594_v32  ;;  %v258_v34 = vsel %vm233_vm1, %v594_v32, 0.0 }
  0x60   : > { %v259_v35 = vrot.slane %v258_v34, 4 }
  0x61   : > { %v265_v36 = vsel %vm233_vm1, %v256_v33, 0.0 }
  0x62   : > { %v260_v38 = vadd.f32 %v259_v35, %v258_v34  ;;  %v266_v39 = vrot.slane %v265_v36, 4 }
  0x64   : > { %v261_v41 = vrot.slane %v260_v38, 2  ;;  %v267_v42 = vadd.f32 %v266_v39, %v265_v36 }
  0x66   : > { %v262_v44 = vadd.f32 %v261_v41, %v260_v38  ;;  %v268_v45 = vrot.slane %v267_v42, 2 }
  0x68   : > { %v263_v47 = vrot.slane %v262_v44, 1  ;;  %v269_v48 = vadd.f32 %v268_v45, %v267_v42 }
  0x6a   : > { %v264_v50 = vadd.f32 %v263_v47, %v262_v44  ;;  %v270_v51 = vrot.slane %v269_v48, 1 }
  0x6c   : > { %v271_v53 = vadd.f32 %v270_v51, %v269_v48  ;;  %595 = vlog2.f32 %v264_v50 }
  0x6e   : > { %597 = vlog2.f32 %v271_v53 }
  0x79   : > { %v596_v61 = vpop.eup %595 }
  0x7a   : > { %v273_v62 = vmul.f32 0.6931472, %v596_v61 }
  0x7b   : > { %v598_v0 = vpop.eup %597 }
  0x7c   : > { %v275_v2 = vmul.f32 0.6931472, %v598_v0  ;;  %v276_v3 = vadd.f32 %v273_v62, %v240_v16 }
  0x7e   : > { %v277_v5 = vadd.f32 %v275_v2, %v247_v19  ;;  %v316_v6 = vsub.f32 %v276_v3, %v308_v63  ;;  %v339_v19 = vsub.s32 %v336_v24, %v897_v18 }
  0x80   : > { %v317_v7 = vsub.f32 %v277_v5, %v315_v4  ;;  %v318_v8 = vsub.f32 0.0, %v316_v6 }
  0x82   : > { %v319_v9 = vsub.f32 0.0, %v317_v7  ;;  %v320_v10 = vmul.f32 1.442695, %v318_v8 }
  0x84   : > { %599 = vpow2.f32 %v320_v10  ;;  %v322_v11 = vmul.f32 1.442695, %v319_v9 }
  0x86   : > { %601 = vpow2.f32 %v322_v11 }
  0x91   : > { %v600_v14 = vpop.eup %599 }
  0x92   : > { %v324_v15 = vsub.f32 1.0, %v600_v14 }
  0x93   : > { %v602_v17 = vpop.eup %601 }
  0x94   : > { %v325_v20 = vsub.f32 1.0, %v602_v17  ;;  %v326_v23 = vmul.f32 0.25, %v324_v15 }
  0x96   : > { %v327_v25 = vmul.f32 0.25, %v325_v20  ;;  %v328_v16 = vmul.f32 %v326_v23, %v316_v6 }
  0x98   : > { %v329_v26 = vmul.f32 %v327_v25, %v317_v7 }
  0x9a   : > { %v333_v27 = vcombine.low %v328_v16, %v329_v26 }
  0x9c   : > { %v340_v28 = vrot.slane %v333_v27, %v339_v19 }
  0x9e   : > { %v347_v30 = vrot.slane %v340_v28, %v339_v19 }
  0xa0   : > { %v349_v31 = vadd.f32 %v347_v30, %v330_v29 }
  0xa2   : > { %354 = vst.msk [vmem:[#allocation2] sm:$0x3] %vm889_vm0, %v349_v31 }
  0xa9   : > { %v358_v32 = vld [vmem:[#allocation2] sm:$0x3] }
  0xaa   : > { %v363_v33 = vrot.slane %v358_v32, %v282_v21  ;;  %v367_v34 = vrot.slane %v358_v32, %v286_v22 }
  0xac   : > { %v371_v35 = vsel %vm370_vm4, %v363_v33, 0.0  ;;  %v372_v36 = vsel %vm370_vm4, %v367_v34, 0.0 }
  0xad   : > { %v373_v37 = vadd.f32 %v372_v36, %v371_v35 }
  0xaf   : > { %374 = vadd.xlane.f32.xlu0 %v373_v37 }
 0x138   : > { %v375_v38 = vpop.xlane.xlu0 %374 }
 0x139   : > { %v376_v39 = vrot.slane %v375_v38, 4 }
 0x13b   : > { %v377_v40 = vadd.f32 %v376_v39, %v375_v38 }
 0x13d   : > { %v378_v1 = vrot.slane %v377_v40, 2 }
 0x13f   : > { %v379_v41 = vadd.f32 %v378_v1, %v377_v40 }
 0x141   : > { %v380_v42 = vrot.slane %v379_v41, 1 }
 0x143   : > { %v381_v43 = vadd.f32 %v380_v42, %v379_v41 }
 0x145   : > { %521 = vpush %v381_v43 }
 0x176   : > { %s522_s28 = spop %521 }
 0x177   : > { %v383_v18 = vstv %s522_s28 }
 0x178   : > { %384 = vst [vmem:[%s216_s21] sm:$0x1] %v383_v18 }
 0x179   : > { %672 = shalt.err (!%p669_p6)
}
 0x17a   : > { %s673_s15 = scalar_lea.hbm %s396_s7, 16  ;;  %s677_s19 = scalar_lea.hbm %s967_s2, 32 }
 0x17b   : > { %p674_p7 = scmp.ne.s32.totalorder %s396_s7, %s673_s15  ;;  %p678_p4 = scmp.lt.s32.totalorder %s396_s7, %s967_s2 }
 0x17c   : > { %p679_p10 = scmp.lt.s32.totalorder %s677_s19, %s673_s15 }
 0x17d   : > { %p675_p1 = pnand %p674_p7, %p816_p9 }
 0x17e   : > { %p680_p8 = por %p679_p10, %p678_p4 }
 0x17f   : > { %p676_p2 = pneg %p675_p1 }
 0x181   : > { %p681_p0 = pnand %p680_p8, %p676_p2 }
 0x183   : > { %684 = shalt.err (!%p681_p0)
}
 0x184   : > { %527 = dma.vmem_to_hbm [thread:$0]  (%p816_p9), %s920_s26, 16, %s396_s7, %s386_s8  }
 0x185 PF: > { %s410_s20 = sand.u32 1, %s723_s9   ;;  %p976_p3 = scmp.ge.s32.totalorder %s743_s14, 2 }
 0x186   : > { %s411_s21 = scalar_lea.sflag [#allocation5], %s410_s20 }
 0x187   : > { %p537_p13 = pnand %p976_p3, %p823_p11 }
 0x189   : > { %p538_p5 = pneg %p537_p13 }
 0x18b   : > { %718 = dma.done.wait (%p538_p5), %s411_s21, 16  }
 0x18c   : > { %720 = vsyncadd (%p538_p5), %s411_s21, 4294967280  ;;  %s21_s14 = sadd.s32 1, %s743_s14   ;;  %s977_s9 = smov %s727_s10 }
 0x18d   : > { %p18_p12 = scmp.ge.s32.totalorder %s21_s14, 4   ;;  %s978_s10 = smov %s731_s11 }
 0x18e   : > { %s979_s11 = smov %s821_s23  ;;  %s980_s12 = smov %s739_s13 }
 0x18f   : > { %s981_s13 = smov %s983_s17  ;;  %20 = sbr.rel (!%p18_p12) target bundleno = 8 (0x8), region = 94 }
 0x194   :  { %415 = vsyncpa [#allocation4], 1 }
 0x195   :  { %417 = vsyncpa [#allocation4 + $0x1], 1 }
 0x196   :  { %418 = vsyncpa [#allocation7], 1 }
 0x197   :  { %420 = vsyncpa [#allocation7 + $0x1], 1 }
 0x198   :  { %421 = vsyncpa [#allocation5], 1 }
 0x199   :  { %423 = vsyncpa [#allocation5 + $0x1], 1 }

</bundles_post_ra>
